<compile_context>
chip_gen: v5e
topology: v5e:2x2
jax: 0.10.0
libtpu: 0.0.40
codegen_flags: <defaults>
</compile_context>

<pallas_src>
import functools
import math

import jax
import jax.numpy as jnp
from jax import lax
from jax.experimental import pallas as pl
from jax.experimental.pallas import tpu as pltpu


def _round_up(x: int, m: int) -> int:
    return ((x + m - 1) // m) * m


def _gelu_exact(x):
    # Matches PyTorch reference: x * 0.5 * (1 + erf(x / sqrt(2)))
    return x * 0.5 * (1.0 + lax.erf(x * (1.0 / math.sqrt(2.0))))


# ---------------------------------------------------------------------------
# Dense (matmul + bias + optional activation) kernel
# ---------------------------------------------------------------------------
def _dense_kernel(x_ref, w_ref, b_ref, o_ref, acc_ref, *, activation):
    k = pl.program_id(2)

    @pl.when(k == 0)
    def _():
        acc_ref[...] = jnp.zeros_like(acc_ref)

    # Keep MXU inputs in their stored dtype; accumulate in f32.
    acc_ref[...] += jnp.dot(x_ref[...], w_ref[...],
                            preferred_element_type=jnp.float32)

    @pl.when(k == pl.num_programs(2) - 1)
    def _():
        y = acc_ref[...] + b_ref[...].astype(jnp.float32)
        if activation == "gelu":
            y = _gelu_exact(y)
        elif activation == "tanh":
            y = jnp.tanh(y)
        o_ref[...] = y.astype(o_ref.dtype)


def dense(x, w, b, *, activation=None, tm=256, tn=512, tk=512):
    """x: [M, K], w: [K, N] (transposed vs torch nn.Linear), b: [N] -> [M, N]."""
    M, K = x.shape
    Kw, N = w.shape
    assert K == Kw

    # Shrink tiles for small problems but keep them (8, 128)-aligned.
    tm_e = min(tm, _round_up(M, 8))
    tn_e = min(tn, _round_up(N, 128))
    tk_e = min(tk, _round_up(K, 128))

    Mp, Np, Kp = _round_up(M, tm_e), _round_up(N, tn_e), _round_up(K, tk_e)
    x_p = jnp.pad(x, ((0, Mp - M), (0, Kp - K)))
    w_p = jnp.pad(w, ((0, Kp - K), (0, Np - N)))
    b_p = jnp.pad(b.reshape(1, N), ((0, 0), (0, Np - N)))

    grid = (Mp // tm_e, Np // tn_e, Kp // tk_e)

    in_bytes = x.dtype.itemsize
    out_bytes = x.dtype.itemsize
    # double-buffered x/w/out tiles + f32 accumulator + bias, with headroom.
    needed = (2 * (tm_e * tk_e + tk_e * tn_e) * in_bytes
              + 2 * tm_e * tn_e * out_bytes
              + tm_e * tn_e * 4 + 2 * tn_e * 4)
    vmem_limit = min(64 * 1024 * 1024, max(32 * 1024 * 1024, 2 * needed))

    cost = pl.CostEstimate(
        flops=2 * M * K * N,
        transcendentals=(M * N if activation in ("gelu", "tanh") else 0),
        bytes_accessed=(M * K + K * N + N) * in_bytes + M * N * out_bytes,
    )

    out = pl.pallas_call(
        functools.partial(_dense_kernel, activation=activation),
        out_shape=jax.ShapeDtypeStruct((Mp, Np), x.dtype),
        grid_spec=pltpu.PrefetchScalarGridSpec(
            num_scalar_prefetch=0,
            grid=grid,
            in_specs=[
                pl.BlockSpec((tm_e, tk_e), lambda i, j, k: (i, k)),
                pl.BlockSpec((tk_e, tn_e), lambda i, j, k: (k, j)),
                pl.BlockSpec((1, tn_e), lambda i, j, k: (0, j)),
            ],
            out_specs=pl.BlockSpec((tm_e, tn_e), lambda i, j, k: (i, j)),
            scratch_shapes=[pltpu.VMEM((tm_e, tn_e), jnp.float32)],
        ),
        compiler_params=pltpu.CompilerParams(
            dimension_semantics=("parallel", "parallel", "arbitrary"),
            vmem_limit_bytes=vmem_limit,
        ),
        cost_estimate=cost,
    )(x_p, w_p, b_p)

    return out[:M, :N]


# ---------------------------------------------------------------------------
# LayerNorm kernel (TF-style, eps inside the sqrt)
# ---------------------------------------------------------------------------
def _layernorm_kernel(x_ref, g_ref, b_ref, o_ref, *, eps):
    x = x_ref[...].astype(jnp.float32)
    u = jnp.mean(x, axis=-1, keepdims=True)
    xc = x - u
    var = jnp.mean(xc * xc, axis=-1, keepdims=True)
    y = xc * lax.rsqrt(var + eps)
    o_ref[...] = (g_ref[...].astype(jnp.float32) * y
                  + b_ref[...].astype(jnp.float32)).astype(o_ref.dtype)


def layernorm(x, gamma, beta, *, eps=1e-12, tm=256):
    M, H = x.shape
    tm_e = min(tm, _round_up(M, 8))
    Mp = _round_up(M, tm_e)
    x_p = jnp.pad(x, ((0, Mp - M), (0, 0)))
    out = pl.pallas_call(
        functools.partial(_layernorm_kernel, eps=eps),
        out_shape=jax.ShapeDtypeStruct((Mp, H), x.dtype),
        grid_spec=pltpu.PrefetchScalarGridSpec(
            num_scalar_prefetch=0,
            grid=(Mp // tm_e,),
            in_specs=[
                pl.BlockSpec((tm_e, H), lambda i: (i, 0)),
                pl.BlockSpec((1, H), lambda i: (0, 0)),
                pl.BlockSpec((1, H), lambda i: (0, 0)),
            ],
            out_specs=pl.BlockSpec((tm_e, H), lambda i: (i, 0)),
        ),
        compiler_params=pltpu.CompilerParams(
            dimension_semantics=("parallel",)),
    )(x_p, gamma.reshape(1, H), beta.reshape(1, H))
    return out[:M]


# ---------------------------------------------------------------------------
# Attention core kernel: one (batch, head) per grid step
# ---------------------------------------------------------------------------
def _attention_kernel(q_ref, k_ref, v_ref, m_ref, o_ref, *, scale):
    q = q_ref[...].astype(jnp.float32)       # (S, d)
    k = k_ref[...].astype(jnp.float32)       # (S, d)
    v = v_ref[...].astype(jnp.float32)       # (S, d)
    mask = m_ref[...].astype(jnp.float32)    # (1, S) additive mask
    s = lax.dot_general(q, k, (((1,), (1,)), ((), ())),
                        preferred_element_type=jnp.float32) * scale + mask
    s = s - jnp.max(s, axis=-1, keepdims=True)
    p = jnp.exp(s)
    p = p / jnp.sum(p, axis=-1, keepdims=True)
    o_ref[...] = jnp.dot(p, v, preferred_element_type=jnp.float32
                         ).astype(o_ref.dtype)


def attention_core(q, k, v, ext_mask):
    """q, k, v: [B, nh, S, d]; ext_mask: [B, 1, S] additive -> [B, nh, S, d]."""
    B, nh, S, d = q.shape
    scale = 1.0 / math.sqrt(d)
    spec_qkv = pl.BlockSpec((None, None, S, d), lambda b, h: (b, h, 0, 0))
    spec_m = pl.BlockSpec((None, 1, S), lambda b, h: (b, 0, 0))
    return pl.pallas_call(
        functools.partial(_attention_kernel, scale=scale),
        out_shape=jax.ShapeDtypeStruct((B, nh, S, d), q.dtype),
        grid_spec=pltpu.PrefetchScalarGridSpec(
            num_scalar_prefetch=0,
            grid=(B, nh),
            in_specs=[spec_qkv, spec_qkv, spec_qkv, spec_m],
            out_specs=pl.BlockSpec((None, None, S, d),
                                   lambda b, h: (b, h, 0, 0)),
        ),
        compiler_params=pltpu.CompilerParams(
            dimension_semantics=("parallel", "parallel")),
    )(q, k, v, ext_mask)


# ---------------------------------------------------------------------------
# Full BertForSequenceClassification forward (inference semantics)
# ---------------------------------------------------------------------------
def bert_forward(params, input_ids, token_type_ids, attention_mask, cfg):
    B, S = input_ids.shape
    H = cfg["hidden_size"]
    nh = cfg["num_attention_heads"]
    d = H // nh

    # Embeddings.
    # TODO(synk): embedding gathers are data-dependent; done in XLA (a Pallas
    # version would need a manual-DMA gather kernel).
    words = jnp.take(params["word_emb"], input_ids, axis=0)
    pos = jnp.take(params["pos_emb"], jnp.arange(S), axis=0)[None, :, :]
    types = jnp.take(params["type_emb"], token_type_ids, axis=0)
    emb = (words + pos + types).reshape(B * S, H)
    h2 = layernorm(emb, params["emb_ln_g"], params["emb_ln_b"])
    # TODO(synk): dropout layers are treated as identity (inference mode).

    ext_mask = (1.0 - attention_mask.astype(h2.dtype))[:, None, :] * (-1000000.0)

    def split_heads(t):
        return t.reshape(B, S, nh, d).transpose(0, 2, 1, 3)

    for lp in params["layers"]:
        x2 = h2
        # Fused QKV projection (block-column concat is arithmetically identical
        # to three separate nn.Linear calls).
        qkv_w = jnp.concatenate([lp["q_w"], lp["k_w"], lp["v_w"]], axis=1)
        qkv_b = jnp.concatenate([lp["q_b"], lp["k_b"], lp["v_b"]], axis=0)
        qkv = dense(x2, qkv_w, qkv_b)                       # [B*S, 3H]
        q, k, v = jnp.split(qkv, 3, axis=1)
        ctx = attention_core(split_heads(q), split_heads(k), split_heads(v),
                             ext_mask)                      # [B, nh, S, d]
        ctx = ctx.transpose(0, 2, 1, 3).reshape(B * S, H)
        ao = dense(ctx, lp["ao_w"], lp["ao_b"])
        ao = layernorm(ao + x2, lp["ao_ln_g"], lp["ao_ln_b"])
        inter = dense(ao, lp["i_w"], lp["i_b"], activation="gelu")
        out = dense(inter, lp["o_w"], lp["o_b"])
        h2 = layernorm(out + ao, lp["o_ln_g"], lp["o_ln_b"])

    seq_out = h2.reshape(B, S, H)
    pooled = dense(seq_out[:, 0, :], params["pool_w"], params["pool_b"],
                   activation="tanh")
    logits = dense(pooled, params["cls_w"], params["cls_b"])
    return logits, pooled, seq_out


# ---------------------------------------------------------------------------
# Pure-JAX reference (mirrors the PyTorch module)
# ---------------------------------------------------------------------------
def _ref_layernorm(x, g, b, eps=1e-12):
    u = jnp.mean(x, axis=-1, keepdims=True)
    s = jnp.mean((x - u) ** 2, axis=-1, keepdims=True)
    return g * ((x - u) / jnp.sqrt(s + eps)) + b


def reference_forward(params, input_ids, token_type_ids, attention_mask, cfg):
    B, S = input_ids.shape
    H = cfg["hidden_size"]
    nh = cfg["num_attention_heads"]
    d = H // nh
    words = params["word_emb"][input_ids]
    pos = params["pos_emb"][jnp.arange(S)][None, :, :]
    types = params["type_emb"][token_type_ids]
    h = _ref_layernorm(words + pos + types,
                       params["emb_ln_g"], params["emb_ln_b"])
    ext = (1.0 - attention_mask.astype(jnp.float32))[:, None, None, :] * (-1000000.0)

    for lp in params["layers"]:
        x2 = h.reshape(B * S, H)

        def heads(t):
            return t.reshape(B, S, nh, d).transpose(0, 2, 1, 3)

        q = heads(x2 @ lp["q_w"] + lp["q_b"])
        k = heads(x2 @ lp["k_w"] + lp["k_b"])
        v = heads(x2 @ lp["v_w"] + lp["v_b"])
        s = jnp.einsum("bhqd,bhkd->bhqk", q, k) / math.sqrt(d) + ext
        p = jax.nn.softmax(s, axis=-1)
        ctx = jnp.einsum("bhqk,bhkd->bhqd", p, v)
        ctx = ctx.transpose(0, 2, 1, 3).reshape(B * S, H)
        ao = _ref_layernorm(ctx @ lp["ao_w"] + lp["ao_b"] + x2,
                            lp["ao_ln_g"], lp["ao_ln_b"])
        inter = x2_i = ao @ lp["i_w"] + lp["i_b"]
        inter = x2_i * 0.5 * (1.0 + lax.erf(x2_i / math.sqrt(2.0)))
        out = _ref_layernorm(inter @ lp["o_w"] + lp["o_b"] + ao,
                             lp["o_ln_g"], lp["o_ln_b"])
        h = out.reshape(B, S, H)

    pooled = jnp.tanh(h[:, 0] @ params["pool_w"] + params["pool_b"])
    logits = pooled @ params["cls_w"] + params["cls_b"]
    return logits, pooled, h


# ---------------------------------------------------------------------------
# Deterministic parameter construction (BERT-style init, weights as [in, out])
# ---------------------------------------------------------------------------
def init_params(key, cfg):
    H, I = cfg["hidden_size"], cfg["intermediate_size"]
    std = cfg["initializer_range"]
    keys = iter(jax.random.split(key, 8 + 14 * cfg["num_hidden_layers"]))

    def nrm(shape):
        return jax.random.normal(next(keys), shape, jnp.float32) * std

    params = {
        "word_emb": nrm((cfg["vocab_size"], H)),
        "pos_emb": nrm((cfg["max_position_embeddings"], H)),
        "type_emb": nrm((cfg["type_vocab_size"], H)),
        "emb_ln_g": 1.0 + nrm((H,)),
        "emb_ln_b": nrm((H,)),
        "pool_w": nrm((H, H)),
        "pool_b": jnp.zeros((H,), jnp.float32),
        "cls_w": nrm((H, cfg["num_labels"])),
        "cls_b": jnp.zeros((cfg["num_labels"],), jnp.float32),
        "layers": [],
    }
    for _ in range(cfg["num_hidden_layers"]):
        params["layers"].append({
            "q_w": nrm((H, H)), "q_b": jnp.zeros((H,), jnp.float32),
            "k_w": nrm((H, H)), "k_b": jnp.zeros((H,), jnp.float32),
            "v_w": nrm((H, H)), "v_b": jnp.zeros((H,), jnp.float32),
            "ao_w": nrm((H, H)), "ao_b": jnp.zeros((H,), jnp.float32),
            "ao_ln_g": 1.0 + nrm((H,)), "ao_ln_b": nrm((H,)),
            "i_w": nrm((H, I)), "i_b": jnp.zeros((I,), jnp.float32),
            "o_w": nrm((I, H)), "o_b": jnp.zeros((H,), jnp.float32),
            "o_ln_g": 1.0 + nrm((H,)), "o_ln_b": nrm((H,)),
        })
    return params


if __name__ == "__main__":
    cfg = dict(vocab_size=100, hidden_size=32, num_hidden_layers=2,
               num_attention_heads=4, intermediate_size=128,
               max_position_embeddings=64, type_vocab_size=2,
               initializer_range=0.02, num_labels=2)
    B, S = 2, 8

    key = jax.random.PRNGKey(0)
    kp, ki, kt = jax.random.split(key, 3)
    params = init_params(kp, cfg)

    input_ids = jax.random.randint(ki, (B, S), 0, cfg["vocab_size"], jnp.int32)
    token_type_ids = jax.random.randint(kt, (B, S), 0, cfg["type_vocab_size"],
                                        jnp.int32)
    attention_mask = jnp.array([[1] * S, [1] * (S - 2) + [0, 0]], jnp.int32)

    logits, pooled, seq = bert_forward(params, input_ids, token_type_ids,
                                       attention_mask, cfg)
    logits = jax.block_until_ready(logits)

    ref_logits, ref_pooled, ref_seq = reference_forward(
        params, input_ids, token_type_ids, attention_mask, cfg)

    assert logits.shape == (B, cfg["num_labels"])
    assert jnp.allclose(seq, ref_seq, atol=2e-4, rtol=2e-4), "sequence mismatch"
    assert jnp.allclose(pooled, ref_pooled, atol=2e-4, rtol=2e-4), "pooled mismatch"
    assert jnp.allclose(logits, ref_logits, atol=2e-4, rtol=2e-4), "logits mismatch"

    print("KERNEL_OK")
</pallas_src>

<mosaic_0001>
module attributes {stable_mosaic.version = 11 : i64} {
  func.func @_layernorm_kernel(%arg0: i32, %arg1: memref<16x32xf32, #tpu.memory_space<vmem>>, %arg2: memref<1x32xf32, #tpu.memory_space<vmem>>, %arg3: memref<1x32xf32, #tpu.memory_space<vmem>>, %arg4: memref<16x32xf32, #tpu.memory_space<vmem>>) attributes {dimension_semantics = [#tpu.dimension_semantics<parallel>], iteration_bounds = array<i64: 1>, scalar_prefetch = 0 : i64, scratch_operands = 0 : i64, tpu.core_type = #tpu.core_type<tc>, window_params = [{transform_indices = @transform_0, window_bounds = array<i64: 16, 32>}, {pipeline_mode = #tpu.pipeline_mode<synchronous>, transform_indices = @transform_1, window_bounds = array<i64: 1, 32>}, {pipeline_mode = #tpu.pipeline_mode<synchronous>, transform_indices = @transform_2, window_bounds = array<i64: 1, 32>}, {transform_indices = @transform_3, window_bounds = array<i64: 16, 32>}]} {
    %c0 = arith.constant 0 : index
    %c0_0 = arith.constant 0 : index
    %0 = vector.load %arg1[%c0, %c0_0] : memref<16x32xf32, #tpu.memory_space<vmem>>, vector<16x32xf32>
    %cst = arith.constant dense<0.000000e+00> : vector<16xf32>
    %1 = vector.multi_reduction <add>, %0, %cst [1] : vector<16x32xf32> to vector<16xf32>
    %2 = vector.shape_cast %1 : vector<16xf32> to vector<16x1xf32>
    %cst_1 = arith.constant 3.200000e+01 : f32
    %3 = vector.broadcast %cst_1 : f32 to vector<16x1xf32>
    %4 = arith.divf %2, %3 : vector<16x1xf32>
    %5 = vector.broadcast %4 : vector<16x1xf32> to vector<16x32xf32>
    %6 = arith.subf %0, %5 : vector<16x32xf32>
    %7 = arith.mulf %6, %6 : vector<16x32xf32>
    %cst_2 = arith.constant dense<0.000000e+00> : vector<16xf32>
    %8 = vector.multi_reduction <add>, %7, %cst_2 [1] : vector<16x32xf32> to vector<16xf32>
    %9 = vector.shape_cast %8 : vector<16xf32> to vector<16x1xf32>
    %cst_3 = arith.constant 3.200000e+01 : f32
    %10 = vector.broadcast %cst_3 : f32 to vector<16x1xf32>
    %11 = arith.divf %9, %10 : vector<16x1xf32>
    %cst_4 = arith.constant 9.99999996E-13 : f32
    %12 = vector.broadcast %cst_4 : f32 to vector<16x1xf32>
    %13 = arith.addf %11, %12 : vector<16x1xf32>
    %14 = math.rsqrt %13 : vector<16x1xf32>
    %15 = vector.broadcast %14 : vector<16x1xf32> to vector<16x32xf32>
    %16 = arith.mulf %6, %15 : vector<16x32xf32>
    %c0_5 = arith.constant 0 : index
    %c0_6 = arith.constant 0 : index
    %17 = vector.load %arg2[%c0_5, %c0_6] : memref<1x32xf32, #tpu.memory_space<vmem>>, vector<1x32xf32>
    %18 = vector.broadcast %17 : vector<1x32xf32> to vector<16x32xf32>
    %19 = arith.mulf %18, %16 : vector<16x32xf32>
    %c0_7 = arith.constant 0 : index
    %c0_8 = arith.constant 0 : index
    %20 = vector.load %arg3[%c0_7, %c0_8] : memref<1x32xf32, #tpu.memory_space<vmem>>, vector<1x32xf32>
    %21 = vector.broadcast %20 : vector<1x32xf32> to vector<16x32xf32>
    %22 = arith.addf %19, %21 : vector<16x32xf32>
    %c0_9 = arith.constant 0 : index
    %c0_10 = arith.constant 0 : index
    %23 = vector.load %arg4[%c0_9, %c0_10] : memref<16x32xf32, #tpu.memory_space<vmem>>, vector<16x32xf32>
    tpu.vector_store %arg4[%c0_9, %c0_10], %22 {strides = array<i32>} : memref<16x32xf32, #tpu.memory_space<vmem>>, vector<16x32xf32>,
    return
  }
  func.func @transform_0(%arg0: i32) -> (i32, i32) {
    %c0_i32 = arith.constant 0 : i32
    %c0_i32_0 = arith.constant 0 : i32
    return %arg0, %c0_i32 : i32, i32
  }
  func.func @transform_1(%arg0: i32) -> (i32, i32) {
    %c0_i32 = arith.constant 0 : i32
    %c0_i32_0 = arith.constant 0 : i32
    %c0_i32_1 = arith.constant 0 : i32
    return %c0_i32, %c0_i32_0 : i32, i32
  }
  func.func @transform_2(%arg0: i32) -> (i32, i32) {
    %c0_i32 = arith.constant 0 : i32
    %c0_i32_0 = arith.constant 0 : i32
    %c0_i32_1 = arith.constant 0 : i32
    return %c0_i32, %c0_i32_0 : i32, i32
  }
  func.func @transform_3(%arg0: i32) -> (i32, i32) {
    %c0_i32 = arith.constant 0 : i32
    %c0_i32_0 = arith.constant 0 : i32
    return %arg0, %c0_i32 : i32, i32
  }
}

</mosaic_0001>

<bundles_post_ra>
// kernel: tpu_custom_call.1
= control target key start
LH: loop header
LB: loop body
LE: loop exit
PB: predicated region body
PF: predicated region fallthrough
CT: control target
= control target key end

     0   :  { %8 = vsyncpa [#allocation3], 0  ;;  %s275_s0 = inlined_call_operand.hbm [shape: f32[16,32], index: 0, kind: input, shape index: {}]   ;;  %s276_s1 = inlined_call_operand.hbm [shape: f32[1,32], index: 1, kind: input, shape index: {}]   ;;  %s277_s2 = inlined_call_operand.vmem [shape: f32[1,32], index: 2, kind: input, shape index: {}]   ;;  %s278_s3 = inlined_call_operand.hbm [shape: f32[16,32], index: 3, kind: output, shape index: {}]  }
   0x1   :  { %9 = vsyncpa [#allocation6], 0 }
   0x2   :  { %10 = vsyncpa [#allocation4], 0  ;;  %s15_s14 = sshll.u32 %s275_s0, 4  ;;  %s225_s15 = smov [#allocation2]   ;;  %s16_s14 = int_to_ptr.hbm [resolvable:$true] %s15_s14 }
   0x3   :  { %s17_s16 = sshll.u32 %s225_s15, 4  ;;  %s29_s19 = sshll.u32 %s276_s1, 4  ;;  %s18_s16 = int_to_ptr.vmem [resolvable:$true] %s17_s16  ;;  %s30_s19 = int_to_ptr.hbm [resolvable:$true] %s29_s19 }
   0x4   :  { %s226_s20 = smov 128   ;;  %s227_s21 = smov 8  }
   0x5   :  { %23 = dma.hbm_to_vmem [thread:$0]  %s16_s14, 256, %s18_s16, [#allocation3], %s226_s20, %s226_s20, %s227_s21  }
   0x6   :  { %s228_s22 = smov [#allocation5]  }
   0x7   :  { %s31_s23 = sshll.u32 %s228_s22, 4  ;;  %s32_s23 = int_to_ptr.vmem [resolvable:$true] %s31_s23 }
   0x8   :  { %34 = dma.hbm_to_vmem [thread:$0]  %s30_s19, 16, %s32_s23, [#allocation6]  }
   0x9   :  { %219 = dma.done.wait [#allocation3], 256  }
   0xa   :  { %220 = vsyncadd [#allocation3], 4294967040 }
   0xb   :  { %221 = dma.done.wait [#allocation6], 16  }
   0xc   :  { %222 = vsyncadd [#allocation6], 4294967280  ;;  %vm47_vm0 = vcmask 261120   ;;  %v45_v0 = vld [vmem:[#allocation2] sm:$0xff]  ;;  %v46_v2 = vld [vmem:[#allocation2 + $0x8] sm:$0xff]  ;;  %v229_v4 = vmov 32.0  }
   0xd   :  { %v48_v1 = vsel %vm47_vm0, %v45_v0, 0.0  ;;  %v51_v3 = vsel %vm47_vm0, %v46_v2, 0.0  ;;  %141 = vrcp.f32 %v229_v4  ;;  %v139_v35 = vld [vmem:[#allocation5] ss:$0 sm:$0xff]  ;;  %v140_v39 = vld [vmem:[%s277_s2] ss:$0 sm:$0xff] }
   0xe   :  { %49 = vadd.xlane.f32.xlu0 %v48_v1  ;;  %s230_s24 = smov [#allocation7]   ;;  %s119_s28 = sshll.u32 %s278_s3, 4  ;;  %s120_s28 = int_to_ptr.hbm [resolvable:$true] %s119_s28 }
   0xf   :  { %s117_s25 = sshll.u32 %s230_s24, 4  ;;  %s118_s25 = int_to_ptr.vmem [resolvable:$true] %s117_s25 }
  0x13   :  { %v142_v5 = vpop.eup %141 }
  0x14   :  { %v55_v6 = vmul.f32 32.0, %v142_v5  ;;  %vm59_vm1 = vweird.f32 %v142_v5 }
  0x16   :  { %52 = vadd.xlane.f32.xlu0 %v51_v3  ;;  %v56_v7 = vsub.f32 1.0, %v55_v6 }
  0x18   :  { %v57_v8 = vmul.f32 %v142_v5, %v56_v7 }
  0x1a   :  { %v58_v9 = vadd.f32 %v142_v5, %v57_v8 }
  0x1c   :  { %v60_v10 = vsel %vm59_vm1, %v142_v5, %v58_v9 }
  0x81   :  { %v50_v11 = vpop.xlane.xlu0 %49 }
  0x82   :  { %v61_v12 = vmul.f32 %v60_v10, %v50_v11 }
  0x84   :  { %v63_v13 = vsub.f32 %v45_v0, %v61_v12 }
  0x86   :  { %v65_v14 = vmul.f32 %v63_v13, %v63_v13 }
  0x88   :  { %v67_v15 = vsel %vm47_vm0, %v65_v14, 0.0 }
  0x89   :  { %68 = vadd.xlane.f32.xlu1 %v67_v15  ;;  %v53_v16 = vpop.xlane.xlu0 %52 }
  0x8a   :  { %v62_v17 = vmul.f32 %v60_v10, %v53_v16 }
  0x8c   :  { %v64_v18 = vsub.f32 %v46_v2, %v62_v17 }
  0x8e   :  { %v66_v19 = vmul.f32 %v64_v18, %v64_v18 }
  0x90   :  { %v70_v20 = vsel %vm47_vm0, %v66_v19, 0.0 }
  0x91   :  { %71 = vadd.xlane.f32.xlu1 %v70_v20 }
  0xfc   :  { %v69_v21 = vpop.xlane.xlu1 %68 }
  0xfd   :  { %v73_v22 = vmul.f32 %v69_v21, %v60_v10 }
  0xff   :  { %v75_v23 = vadd.f32 1e-12, %v73_v22 }
 0x101   :  { %143 = vrsqrt.f32 %v75_v23  ;;  %vm83_vm3 = vweird.f32 %v75_v23 }
 0x104   :  { %v72_v24 = vpop.xlane.xlu1 %71 }
 0x105   :  { %v74_v25 = vmul.f32 %v72_v24, %v60_v10 }
 0x107   :  { %v144_v26 = vpop.eup %143  ;;  %v76_v27 = vadd.f32 1e-12, %v74_v25 }
 0x108   :  { %v78_v28 = vmul.f32 %v144_v26, %v75_v23  ;;  %vm84_vm2 = vweird.f32 %v144_v26 }
 0x109   :  { %145 = vrsqrt.f32 %v76_v27  ;;  %vm85_vm4 = vmor %vm83_vm3, %vm84_vm2  ;;  %vm93_vm6 = vweird.f32 %v76_v27 }
 0x10a   :  { %v79_v29 = vmul.f32 %v144_v26, %v78_v28 }
 0x10c   :  { %v80_v30 = vmul.f32 0.5, %v79_v29 }
 0x10e   :  { %v81_v31 = vsub.f32 1.5, %v80_v30 }
 0x10f   :  { %v146_v32 = vpop.eup %145 }
 0x110   :  { %v82_v33 = vmul.f32 %v144_v26, %v81_v31  ;;  %v88_v34 = vmul.f32 %v146_v32, %v76_v27  ;;  %vm94_vm5 = vweird.f32 %v146_v32 }
 0x111   :  { %vm95_vm7 = vmor %vm93_vm6, %vm94_vm5 }
 0x112   :  { %v86_v36 = vsel %vm85_vm4, %v144_v26, %v82_v33  ;;  %v89_v37 = vmul.f32 %v146_v32, %v88_v34 }
 0x113   :  { %v97_v38 = vmul.f32 %v86_v36, %v63_v13 }
 0x114   :  { %v90_v40 = vmul.f32 0.5, %v89_v37 }
 0x115   :  { %v103_v41 = vmul.f32 %v139_v35, %v97_v38 }
 0x116   :  { %v91_v42 = vsub.f32 1.5, %v90_v40 }
 0x117   :  { %v109_v43 = vadd.f32 %v140_v39, %v103_v41 }
 0x118   :  { %v92_v44 = vmul.f32 %v146_v32, %v91_v42 }
 0x119   :  { %111 = vst.msk [vmem:[#allocation7] sm:$0xff] %vm47_vm0, %v109_v43 }
 0x11a   :  { %v96_v45 = vsel %vm95_vm7, %v146_v32, %v92_v44 }
 0x11b   :  { %v98_v46 = vmul.f32 %v96_v45, %v64_v18 }
 0x11d   :  { %v104_v47 = vmul.f32 %v139_v35, %v98_v46 }
 0x11f   :  { %v110_v48 = vadd.f32 %v140_v39, %v104_v47 }
 0x121   :  { %112 = vst.msk [vmem:[#allocation7 + $0x8] sm:$0xff] %vm47_vm0, %v110_v48 }
 0x122   :  { %125 = dma.vmem_to_hbm [thread:$0]  %s118_s25, 256, %s120_s28, [#allocation4], %s226_s20, %s226_s20, %s227_s21  }
 0x123   :  { %223 = dma.done.wait [#allocation4], 256  }
 0x124   :  { %224 = vsyncadd [#allocation4], 4294967040 }
 0x125   :  { %130 = vsyncpa [#allocation3], 1 }
 0x126   :  { %131 = vsyncpa [#allocation6], 1 }
 0x127   :  { %132 = vsyncpa [#allocation4], 1 }

</bundles_post_ra>
